<compile_context>
chip_gen: v7x
topology: tpu7x:2x2x1
jax: 0.10.0
libtpu: 0.0.40
codegen_flags: <defaults>
</compile_context>

<pallas_src>
import functools

import jax
import jax.numpy as jnp
from jax.experimental import pallas as pl
from jax.experimental.pallas import tpu as pltpu


_TILE_CAP_ROWS = 8192                  # hard cap on rows per batch tile
_SINGLE_BLOCK_ROWS = 256               # below this, one whole-batch block
_VMEM_TILE_BUDGET = 12 * 1024 * 1024   # per-step VMEM footprint budget (bytes)


# ----------------------------- Pallas kernel ------------------------------- #

def _fused_pcnn_kernel(x_ref, phi_ref, c_ref, *rest, act_name, n_layers):
    """Fused MLP chain + PCE head, writing a lane-dense (num_c+1, tile_n) block.

    rest = (w0, b0, ..., w_{L-2}, b_{L-2}, wT_last, bcol_last, out_ref)

    Hidden layers run in the natural (rows, features) orientation; the final
    Linear and the PCE head are computed as A @ B^T so their results land
    already transposed (features on sublanes, batch rows on lanes).
    """
    param_refs = rest[:2 * n_layers]
    out_ref = rest[2 * n_layers]

    # ---- hidden layers (activations stay in vregs, f32 accumulation) ----
    h = x_ref[...]                                       # (tile_n, dim)
    for i in range(n_layers - 1):
        w = param_refs[2 * i][...]                       # (in, out)
        b = param_refs[2 * i + 1][...]                   # (1, out) -> broadcast
        h = jnp.dot(h, w, preferred_element_type=jnp.float32) + b
        if act_name == "relu":
            h = jnp.maximum(h, 0.0)
        else:
            # Exact erf-GELU matches torch.nn.GELU default.  On v5e,
            # approximate=True (tanh -> EUP slot) is cheaper if tolerable.
            h = jax.nn.gelu(h, approximate=False)

    # ---- final Linear, transposed result: (num_c, tile_n) = W^T @ h^T ----
    w_t = param_refs[2 * (n_layers - 1)][...]            # (num_c, hid_last)
    b_col = param_refs[2 * (n_layers - 1) + 1][...]      # (num_c, 1)
    c_t = jax.lax.dot_general(
        w_t, h, (((1,), (1,)), ((), ())),
        preferred_element_type=jnp.float32) + b_col      # (num_c, tile_n)

    # ---- PCE head on the MXU, transposed: (1, tile_n) = c_row @ phi^T ----
    y_t = jax.lax.dot_general(
        c_ref[...], phi_ref[...], (((1,), (1,)), ((), ())),
        preferred_element_type=jnp.float32)              # (1, tile_n)

    num_c = c_t.shape[0]
    out_ref[:num_c, :] = c_t.astype(out_ref.dtype)
    out_ref[num_c:, :] = y_t.astype(out_ref.dtype)


# ------------------------------ fused wrapper ------------------------------- #

def _choose_tile_rows(n, dim, p, num_c, max_width, itemsize):
    """Pick the batch-tile row count from the real per-tile VMEM footprint."""
    if n <= _SINGLE_BLOCK_ROWS:
        return n                                   # single block, full extents
    # double-buffered streamed tiles (x, phi, merged out) + live f32 activations
    bytes_per_row = 2 * itemsize * (dim + p + num_c + 1) + 4 * 3 * max_width
    t = _VMEM_TILE_BUDGET // max(bytes_per_row, 1)
    t = min(t, _TILE_CAP_ROWS)
    # >= 2 grid steps on the "parallel" axis so v7x's 2nd TensorCore gets work
    half = (((n + 1) // 2) + 127) // 128 * 128
    t = min(t, half)
    return max(128, (t // 128) * 128)


@functools.partial(jax.jit, static_argnames=("act_name",))
def pcnn_forward(x, phi_x, c, weights, biases, act_name):
    """Single-pallas_call forward.  weights/biases are tuples of arrays."""
    n, dim = x.shape
    p = phi_x.shape[1]
    n_layers = len(weights)
    num_c = weights[-1].shape[1]
    max_width = max(w.shape[1] for w in weights)
    itemsize = jnp.dtype(x.dtype).itemsize

    c2d = c.reshape(1, p)
    w_last_t = weights[-1].T                    # (num_c, hid_last)
    b_last_col = biases[-1].reshape(num_c, 1)   # (num_c, 1)

    tile_n = _choose_tile_rows(n, dim, p, num_c, max_width, itemsize)
    grid = (pl.cdiv(n, tile_n),)                # ragged last block handled by Pallas

    # Inputs: batch-tiled x / phi; PCE coeffs + weights/biases resident.
    in_specs = [
        pl.BlockSpec((tile_n, dim), lambda i: (i, 0)),
        pl.BlockSpec((tile_n, p), lambda i: (i, 0)),
        pl.BlockSpec((1, p), lambda i: (0, 0)),
    ]
    params_flat = []
    for w, b in zip(weights[:-1], biases[:-1]):
        in_specs.append(pl.BlockSpec(w.shape, lambda i: (0, 0)))
        in_specs.append(pl.BlockSpec(b.shape, lambda i: (0, 0)))
        params_flat.extend([w, b])
    in_specs.append(pl.BlockSpec(w_last_t.shape, lambda i: (0, 0)))
    in_specs.append(pl.BlockSpec(b_last_col.shape, lambda i: (0, 0)))
    params_flat.extend([w_last_t, b_last_col])

    # Single merged, transposed (lane-dense) output slab.
    out_specs = pl.BlockSpec((num_c + 1, tile_n), lambda i: (0, i))
    out_shape = jax.ShapeDtypeStruct((num_c + 1, n), x.dtype)

    # Advisory cost estimate (actual itemsizes, unpadded batch).
    flops = 2 * n * p
    bytes_accessed = (x.size + phi_x.size + c2d.size + (num_c + 1) * n) * itemsize
    for w, b in zip(weights, biases):
        flops += 2 * n * w.shape[0] * w.shape[1]
        bytes_accessed += (w.size + b.size) * jnp.dtype(w.dtype).itemsize
    transcendentals = 0 if act_name == "relu" else n * sum(
        w.shape[1] for w in weights[:-1])

    kernel = functools.partial(_fused_pcnn_kernel,
                               act_name=act_name, n_layers=n_layers)

    out_t = pl.pallas_call(
        kernel,
        grid=grid,
        in_specs=in_specs,
        out_specs=out_specs,
        out_shape=out_shape,
        compiler_params=pltpu.CompilerParams(
            dimension_semantics=("parallel",),
            vmem_limit_bytes=32 * 1024 * 1024),
        cost_estimate=pl.CostEstimate(
            flops=int(flops), transcendentals=int(transcendentals),
            bytes_accessed=int(bytes_accessed)),
    )(x, phi_x, c2d, *params_flat)

    # Tiny layout plumbing back to the PyTorch-facing shapes (n*(num_c+1) elems).
    c_out = out_t[:num_c, :].T        # (n, num_c)
    y_pce = out_t[num_c:, :].T        # (n, 1)
    return c_out, y_pce


# ------------------------------ Module wrapper ------------------------------ #

class PCNNPallas:
    """JAX/Pallas port of the PyTorch PCNN module (fused forward)."""

    def __init__(self, dim, num_c, hiden_neurons, c, act_fun="Relu", key=None):
        if act_fun.lower() == "relu":
            self.act_name = "relu"
        elif act_fun.lower() == "gelu":
            self.act_name = "gelu"
        else:
            raise ValueError("unsupported activation")

        # Mirror the PyTorch list construction: [dim] + hiden_neurons + [num_c]
        sizes = [dim] + list(hiden_neurons) + [num_c]
        self.c = jnp.asarray(c, dtype=jnp.float32)

        if key is None:
            key = jax.random.PRNGKey(0)
        weights, biases = [], []
        for i in range(len(sizes) - 1):
            key, kw, kb = jax.random.split(key, 3)
            fan_in = sizes[i]
            bound = 1.0 / jnp.sqrt(jnp.asarray(fan_in, jnp.float32))
            w = jax.random.uniform(kw, (sizes[i], sizes[i + 1]),
                                   minval=-bound, maxval=bound,
                                   dtype=jnp.float32)
            b = jax.random.uniform(kb, (1, sizes[i + 1]),
                                   minval=-bound, maxval=bound,
                                   dtype=jnp.float32)
            weights.append(w)
            biases.append(b)
        self.weights = tuple(weights)
        self.biases = tuple(biases)

    def __call__(self, x, phi_x):
        return pcnn_forward(x, phi_x, self.c, self.weights, self.biases,
                            self.act_name)

    # Pure-JAX reference for correctness checking.
    def reference(self, x, phi_x):
        h = x
        n_layers = len(self.weights)
        for i, (w, b) in enumerate(zip(self.weights, self.biases)):
            h = h @ w + b
            if i < n_layers - 1:
                h = jnp.maximum(h, 0.0) if self.act_name == "relu" \
                    else jax.nn.gelu(h, approximate=False)
        y_pce = jnp.sum(phi_x * self.c.reshape(1, -1), axis=1, keepdims=True)
        return h, y_pce


# ---------------------------------- main ------------------------------------ #

if __name__ == "__main__":
    key = jax.random.PRNGKey(0)
    k_x, k_phi, k_c, k_params, k_x2, k_phi2 = jax.random.split(key, 6)

    batch = 8
    dim = 16
    hidden = [32, 24]
    num_c = 4
    n_pce = 8            # number of PCE basis functions (phi_x second dim)

    x = jax.random.normal(k_x, (batch, dim), dtype=jnp.float32)
    phi_x = jax.random.normal(k_phi, (batch, n_pce), dtype=jnp.float32)
    c_param = jax.random.normal(k_c, (n_pce,), dtype=jnp.float32)

    model = PCNNPallas(dim, num_c, hidden, c_param, act_fun="Relu",
                       key=k_params)

    # Small batch: single whole-batch block.
    c_out, y_pce = model(x, phi_x)
    jax.block_until_ready((c_out, y_pce))
    c_ref, y_ref = model.reference(x, phi_x)
    assert c_out.shape == (batch, num_c)
    assert y_pce.shape == (batch, 1)
    assert jnp.allclose(c_out, c_ref, atol=1e-4, rtol=1e-4)
    assert jnp.allclose(y_pce, y_ref, atol=1e-4, rtol=1e-4)

    # Moderate batch: exercises the multi-step grid with a ragged last block
    # (tile_n = 256 -> grid of 2, last block masked on write-back).
    batch2 = 300
    x2 = jax.random.normal(k_x2, (batch2, dim), dtype=jnp.float32)
    phi2 = jax.random.normal(k_phi2, (batch2, n_pce), dtype=jnp.float32)
    c_out2, y_pce2 = model(x2, phi2)
    jax.block_until_ready((c_out2, y_pce2))
    c_ref2, y_ref2 = model.reference(x2, phi2)
    assert c_out2.shape == (batch2, num_c)
    assert y_pce2.shape == (batch2, 1)
    assert jnp.allclose(c_out2, c_ref2, atol=1e-4, rtol=1e-4)
    assert jnp.allclose(y_pce2, y_ref2, atol=1e-4, rtol=1e-4)

    print("KERNEL_OK")
</pallas_src>

<mosaic_0001>
module attributes {stable_mosaic.version = 11 : i64} {
  func.func @_fused_pcnn_kernel(%arg0: i32, %arg1: memref<8x16xf32, #tpu.memory_space<vmem>>, %arg2: memref<8x8xf32, #tpu.memory_space<vmem>>, %arg3: memref<1x8xf32, #tpu.memory_space<vmem>>, %arg4: memref<16x32xf32, #tpu.memory_space<vmem>>, %arg5: memref<1x32xf32, #tpu.memory_space<vmem>>, %arg6: memref<32x24xf32, #tpu.memory_space<vmem>>, %arg7: memref<1x24xf32, #tpu.memory_space<vmem>>, %arg8: memref<4x24xf32, #tpu.memory_space<vmem>>, %arg9: memref<4x1xf32, #tpu.memory_space<vmem>>, %arg10: memref<5x8xf32, #tpu.memory_space<vmem>>) attributes {dimension_semantics = [#tpu.dimension_semantics<parallel>], iteration_bounds = array<i64: 1>, scalar_prefetch = 0 : i64, scratch_operands = 0 : i64, tpu.core_type = #tpu.core_type<tc>, window_params = [{transform_indices = @transform_0, window_bounds = array<i64: 8, 16>}, {transform_indices = @transform_1, window_bounds = array<i64: 8, 8>}, {pipeline_mode = #tpu.pipeline_mode<synchronous>, transform_indices = @transform_2, window_bounds = array<i64: 1, 8>}, {pipeline_mode = #tpu.pipeline_mode<synchronous>, transform_indices = @transform_3, window_bounds = array<i64: 16, 32>}, {pipeline_mode = #tpu.pipeline_mode<synchronous>, transform_indices = @transform_4, window_bounds = array<i64: 1, 32>}, {pipeline_mode = #tpu.pipeline_mode<synchronous>, transform_indices = @transform_5, window_bounds = array<i64: 32, 24>}, {pipeline_mode = #tpu.pipeline_mode<synchronous>, transform_indices = @transform_6, window_bounds = array<i64: 1, 24>}, {pipeline_mode = #tpu.pipeline_mode<synchronous>, transform_indices = @transform_7, window_bounds = array<i64: 4, 24>}, {pipeline_mode = #tpu.pipeline_mode<synchronous>, transform_indices = @transform_8, window_bounds = array<i64: 4, 1>}, {transform_indices = @transform_9, window_bounds = array<i64: 5, 8>}]} {
    %c0 = arith.constant 0 : index
    %c0_0 = arith.constant 0 : index
    %0 = vector.load %arg1[%c0, %c0_0] : memref<8x16xf32, #tpu.memory_space<vmem>>, vector<8x16xf32>
    %c0_1 = arith.constant 0 : index
    %c0_2 = arith.constant 0 : index
    %1 = vector.load %arg4[%c0_1, %c0_2] : memref<16x32xf32, #tpu.memory_space<vmem>>, vector<16x32xf32>
    %c0_3 = arith.constant 0 : index
    %c0_4 = arith.constant 0 : index
    %2 = vector.load %arg5[%c0_3, %c0_4] : memref<1x32xf32, #tpu.memory_space<vmem>>, vector<1x32xf32>
    %cst = arith.constant dense<0.000000e+00> : vector<8x32xf32>
    %3 = tpu.matmul %0, %1, %cst {dimension_numbers = #tpu.dot_dimension_numbers<[1], [0], [0], [1], [0, 0, 1, 1], [], []>} : vector<8x16xf32>, vector<16x32xf32>, vector<8x32xf32> -> vector<8x32xf32>
    %4 = vector.broadcast %2 : vector<1x32xf32> to vector<8x32xf32>
    %5 = arith.addf %3, %4 : vector<8x32xf32>
    %cst_5 = arith.constant 0.000000e+00 : f32
    %6 = vector.broadcast %cst_5 : f32 to vector<8x32xf32>
    %7 = arith.maximumf %5, %6 : vector<8x32xf32>
    %c0_6 = arith.constant 0 : index
    %c0_7 = arith.constant 0 : index
    %8 = vector.load %arg6[%c0_6, %c0_7] : memref<32x24xf32, #tpu.memory_space<vmem>>, vector<32x24xf32>
    %c0_8 = arith.constant 0 : index
    %c0_9 = arith.constant 0 : index
    %9 = vector.load %arg7[%c0_8, %c0_9] : memref<1x24xf32, #tpu.memory_space<vmem>>, vector<1x24xf32>
    %cst_10 = arith.constant dense<0.000000e+00> : vector<8x24xf32>
    %10 = tpu.matmul %7, %8, %cst_10 {dimension_numbers = #tpu.dot_dimension_numbers<[1], [0], [0], [1], [0, 0, 1, 1], [], []>} : vector<8x32xf32>, vector<32x24xf32>, vector<8x24xf32> -> vector<8x24xf32>
    %11 = vector.broadcast %9 : vector<1x24xf32> to vector<8x24xf32>
    %12 = arith.addf %10, %11 : vector<8x24xf32>
    %cst_11 = arith.constant 0.000000e+00 : f32
    %13 = vector.broadcast %cst_11 : f32 to vector<8x24xf32>
    %14 = arith.maximumf %12, %13 : vector<8x24xf32>
    %c0_12 = arith.constant 0 : index
    %c0_13 = arith.constant 0 : index
    %15 = vector.load %arg8[%c0_12, %c0_13] : memref<4x24xf32, #tpu.memory_space<vmem>>, vector<4x24xf32>
    %c0_14 = arith.constant 0 : index
    %c0_15 = arith.constant 0 : index
    %16 = vector.load %arg9[%c0_14, %c0_15] : memref<4x1xf32, #tpu.memory_space<vmem>>, vector<4x1xf32>
    %cst_16 = arith.constant dense<0.000000e+00> : vector<4x8xf32>
    %17 = tpu.matmul %15, %14, %cst_16 {dimension_numbers = #tpu.dot_dimension_numbers<[1], [1], [0], [0], [0, 0, 1, 0], [], []>} : vector<4x24xf32>, vector<8x24xf32>, vector<4x8xf32> -> vector<4x8xf32>
    %18 = vector.broadcast %16 : vector<4x1xf32> to vector<4x8xf32>
    %19 = arith.addf %17, %18 : vector<4x8xf32>
    %c0_17 = arith.constant 0 : index
    %c0_18 = arith.constant 0 : index
    %20 = vector.load %arg3[%c0_17, %c0_18] : memref<1x8xf32, #tpu.memory_space<vmem>>, vector<1x8xf32>
    %c0_19 = arith.constant 0 : index
    %c0_20 = arith.constant 0 : index
    %21 = vector.load %arg2[%c0_19, %c0_20] : memref<8x8xf32, #tpu.memory_space<vmem>>, vector<8x8xf32>
    %cst_21 = arith.constant dense<0.000000e+00> : vector<1x8xf32>
    %22 = tpu.matmul %20, %21, %cst_21 {dimension_numbers = #tpu.dot_dimension_numbers<[1], [1], [0], [0], [0, 0, 1, 0], [], []>} : vector<1x8xf32>, vector<8x8xf32>, vector<1x8xf32> -> vector<1x8xf32>
    %c0_22 = arith.constant 0 : index
    %c0_23 = arith.constant 0 : index
    %23 = vector.load %arg10[%c0_22, %c0_23] : memref<5x8xf32, #tpu.memory_space<vmem>>, vector<4x8xf32>
    tpu.vector_store %arg10[%c0_22, %c0_23], %19 {strides = array<i32>} : memref<5x8xf32, #tpu.memory_space<vmem>>, vector<4x8xf32>,
    %c4 = arith.constant 4 : index
    %c0_24 = arith.constant 0 : index
    %24 = vector.load %arg10[%c4, %c0_24] : memref<5x8xf32, #tpu.memory_space<vmem>>, vector<1x8xf32>
    tpu.vector_store %arg10[%c4, %c0_24], %22 {strides = array<i32>} : memref<5x8xf32, #tpu.memory_space<vmem>>, vector<1x8xf32>,
    return
  }
  func.func @transform_0(%arg0: i32) -> (i32, i32) {
    %c0_i32 = arith.constant 0 : i32
    %c0_i32_0 = arith.constant 0 : i32
    return %arg0, %c0_i32 : i32, i32
  }
  func.func @transform_1(%arg0: i32) -> (i32, i32) {
    %c0_i32 = arith.constant 0 : i32
    %c0_i32_0 = arith.constant 0 : i32
    return %arg0, %c0_i32 : i32, i32
  }
  func.func @transform_2(%arg0: i32) -> (i32, i32) {
    %c0_i32 = arith.constant 0 : i32
    %c0_i32_0 = arith.constant 0 : i32
    %c0_i32_1 = arith.constant 0 : i32
    return %c0_i32, %c0_i32_0 : i32, i32
  }
  func.func @transform_3(%arg0: i32) -> (i32, i32) {
    %c0_i32 = arith.constant 0 : i32
    %c0_i32_0 = arith.constant 0 : i32
    %c0_i32_1 = arith.constant 0 : i32
    return %c0_i32, %c0_i32_0 : i32, i32
  }
  func.func @transform_4(%arg0: i32) -> (i32, i32) {
    %c0_i32 = arith.constant 0 : i32
    %c0_i32_0 = arith.constant 0 : i32
    %c0_i32_1 = arith.constant 0 : i32
    return %c0_i32, %c0_i32_0 : i32, i32
  }
  func.func @transform_5(%arg0: i32) -> (i32, i32) {
    %c0_i32 = arith.constant 0 : i32
    %c0_i32_0 = arith.constant 0 : i32
    %c0_i32_1 = arith.constant 0 : i32
    return %c0_i32, %c0_i32_0 : i32, i32
  }
  func.func @transform_6(%arg0: i32) -> (i32, i32) {
    %c0_i32 = arith.constant 0 : i32
    %c0_i32_0 = arith.constant 0 : i32
    %c0_i32_1 = arith.constant 0 : i32
    return %c0_i32, %c0_i32_0 : i32, i32
  }
  func.func @transform_7(%arg0: i32) -> (i32, i32) {
    %c0_i32 = arith.constant 0 : i32
    %c0_i32_0 = arith.constant 0 : i32
    %c0_i32_1 = arith.constant 0 : i32
    return %c0_i32, %c0_i32_0 : i32, i32
  }
  func.func @transform_8(%arg0: i32) -> (i32, i32) {
    %c0_i32 = arith.constant 0 : i32
    %c0_i32_0 = arith.constant 0 : i32
    %c0_i32_1 = arith.constant 0 : i32
    return %c0_i32, %c0_i32_0 : i32, i32
  }
  func.func @transform_9(%arg0: i32) -> (i32, i32) {
    %c0_i32 = arith.constant 0 : i32
    %c0_i32_0 = arith.constant 0 : i32
    return %c0_i32, %arg0 : i32, i32
  }
}

</mosaic_0001>

<bundles_post_ra>
// kernel: pcnn_forward.1
= control target key start
LH: loop header
LB: loop body
LE: loop exit
PB: predicated region body
PF: predicated region fallthrough
CT: control target
= control target key end

     0   :  { %v436_v0 = vmov 0.0|0.0   ;;  %vm437_vm0 = vmmov 0   ;;  %v438_v3 = vmov 0.0   ;;  %vm42_vm1 = vcmask 130048   ;;  %s539_s3 = inlined_call_operand.vmem [shape: f32[16,32], index: 3, kind: input, shape index: {}]   ;;  %s540_s5 = inlined_call_operand.vmem [shape: f32[32,24], index: 5, kind: input, shape index: {}]   ;;  %s541_s0 = inlined_call_operand.vmem [shape: f32[8,16], index: 0, kind: input, shape index: {}]   ;;  %s542_s4 = inlined_call_operand.vmem [shape: f32[1,32], index: 4, kind: input, shape index: {}]   ;;  %s543_s8 = inlined_call_operand.vmem [shape: f32[4,1], index: 8, kind: input, shape index: {}]   ;;  %s544_s6 = inlined_call_operand.vmem [shape: f32[1,24], index: 6, kind: input, shape index: {}]   ;;  %s545_s7 = inlined_call_operand.vmem [shape: f32[4,24], index: 7, kind: input, shape index: {}]   ;;  %s546_s1 = inlined_call_operand.vmem [shape: f32[8,8], index: 1, kind: input, shape index: {}]   ;;  %s547_s2 = inlined_call_operand.vmem [shape: f32[1,8], index: 2, kind: input, shape index: {}]   ;;  %s548_s9 = inlined_call_operand.vmem [shape: f32[5,8], index: 9, kind: output, shape index: {}]  }
   0x1   :  { %422 = vmatprep.subr.bf16.mxu0 %v436_v0  ;;  %v33_v1 = vld [vmem:[%s539_s3] sm:$0xff]  ;;  %v34_v2 = vld [vmem:[%s539_s3 + $0x8] sm:$0xff]  ;;  %398 = vmatprep.mubr.msk.f32.mxu0 %vm437_vm0, %v438_v3  ;;  %v119_v9 = vld [vmem:[%s540_s5 + $0x10] sm:$0xff]  ;;  %vm128_vm2 = vcmask 261120   ;;  %v439_v17 = vmov 0   ;;  %vm210_vm3 = vcmask 195584  }
   0x2   :  { %v423_v4 = vpack.c.bf16 %v34_v2, %v33_v1  ;;  %425 = vmatprep.subr.bf16.mxu1 %v436_v0  ;;  %v117_v5 = vld [vmem:[%s540_s5] sm:$0xff]  ;;  %v118_v6 = vld [vmem:[%s540_s5 + $0x8] sm:$0xff]  ;;  %409 = vmatprep.mubr.msk.f32.mxu1 %vm437_vm0, %v438_v3  ;;  %v120_v10 = vld [vmem:[%s540_s5 + $0x18] sm:$0xff]  ;;  %vm289_vm4 = vcmask 64512   ;;  %vm366_vm5 = vcmask 60416   ;;  %vm368_vm6 = vcmask 57344  }
   0x3   :  { %v426_v7 = vpack.c.bf16 %v118_v6, %v117_v5  ;;  %v32_v8 = vld [vmem:[%s541_s0] sm:$0xff]  ;;  %v429_v11 = vpack.c.bf16 %v120_v10, %v119_v9  ;;  %435 = vset.pattern.permute.xlu0 %v439_v17 }
   0x4   :  { %424 = vmatpush3.bf16.msra.mxu0 %v423_v4  ;;  %v374_v12 = vld [vmem:[%s542_s4] ss:$0 sm:$0xff] }
   0x5   :  { %427 = vmatpush3.bf16.msra.mxu1 %v426_v7  ;;  %412 = vmatprep.subr.mxu0 %v438_v3  ;;  %v204_v18 = vld [vmem:[%s543_s8] sm:$0xf] }
   0x6   :  { %428 = vmatprep.subr.bf16.mxu1 %v436_v0  ;;  %207 = vperm.xlu0 %435, %v204_v18   ;;  %v376_v19 = vld [vmem:[%s544_s6] ss:$0 sm:$0xff] }
   0x7   :  { %399 = vmatmul.mubr.msk.f32.vlgmr.msra.gmra.mrb[0].mxu0 %vm42_vm1, %v32_v8  ;;  %v203_v24 = vld [vmem:[%s545_s7] sm:$0xf] }
   0x8   :  { %414 = vmatprep.mubr.msk.f32.mxu0 %vm437_vm0, %v438_v3  ;;  %v288_v25 = vld [vmem:[%s546_s1] sm:$0xff] }
   0x9   :  { %430 = vmatpush3.bf16.msra.mxu1 %v429_v11  ;;  %v287_v26 = vld [vmem:[%s547_s2] sm:$0x1] }
  0x85   :  { %v208_v27 = vpop.permute.xlu0 %207 }
  0xda   :  { %v112_v13 = vpop.f32.mrb[0].mxu0 }
  0xdb   :  { %v113_v14 = vadd.f32 %v374_v12, %v112_v13  ;;  %v400_v15 = vpop.f32.mrb[1].mxu0 }
  0xdd   :  { %v116_v16 = vmax.f32 %v113_v14, 0.0 }
  0xdf   :  { %410 = vmatmul.mubr.msk.f32.vlgmr.msra.gmra.mrb[0].mxu1 %vm128_vm2, %v116_v16 }
 0x1b2   :  { %v198_v20 = vpop.f32.mrb[0].mxu1 }
 0x1b3   :  { %v199_v21 = vadd.f32 %v376_v19, %v198_v20  ;;  %v411_v22 = vpop.f32.mrb[1].mxu1 }
 0x1b5   :  { %v202_v23 = vmax.f32 %v199_v21, 0.0 }
 0x1b7   :  { %413 = vmatpush3.xpose.msk.msra.mxu0 %vm210_vm3, %v202_v23 }
 0x1b8   :  { %417 = vmatprep.subr.mxu0 %v438_v3 }
 0x1ba   :  { %415 = vmatmul.mubr.msk.f32.vlgmr.msra.gmra.mrb[2].mxu0 %vm210_vm3, %v203_v24 }
 0x1bb   :  { %418 = vmatpush3.xpose.msk.msra.mxu0 %vm289_vm4, %v288_v25  ;;  %419 = vmatprep.mubr.msk.f32.mxu0 %vm437_vm0, %v438_v3 }
 0x1be   :  { %420 = vmatmul.mubr.msk.f32.vlgmr.msra.gmra.mrb[4].mxu0 %vm289_vm4, %v287_v26 }
 0x28d   :  { %v283_v28 = vpop.f32.mrb[2].mxu0 }
 0x28e   :  { %v284_v29 = vadd.f32 %v283_v28, %v208_v27  ;;  %v416_v30 = vpop.f32.mrb[3].mxu0 }
 0x290   :  { %367 = vst.msk [vmem:[%s548_s9] sm:$0xf] %vm366_vm5, %v284_v29 }
 0x291   :  { %v362_v31 = vpop.f32.mrb[4].mxu0 }
 0x292   :  { %369 = vst.msk [vmem:[%s548_s9 + $0x4] sm:$0x1] %vm368_vm6, %v362_v31  ;;  %v421_v32 = vpop.f32.mrb[5].mxu0 }

</bundles_post_ra>
